<compile_context>
chip_gen: v5e
topology: v5e:2x2
jax: 0.10.0
libtpu: 0.0.40
codegen_flags: <defaults>
</compile_context>

<pallas_src>
import functools

import jax
import jax.numpy as jnp
from jax.experimental import pallas as pl
from jax.experimental.pallas import tpu as pltpu


def _bce_with_logits_kernel(x_ref, y_ref, o_ref, acc_ref, *, block_b, acc_rows):
    j = pl.program_id(1)  # column (reduction) axis, iterates fastest

    @pl.when(j == 0)
    def _():
        acc_ref[...] = jnp.zeros_like(acc_ref)

    x = x_ref[...].astype(jnp.float32)
    y = y_ref[...].astype(jnp.float32)

    # Numerically stable BCE-with-logits:
    #   loss = max(x, 0) - x*y + log(1 + exp(-|x|))
    elem = jnp.maximum(x, 0.0) - x * y + jnp.log(1.0 + jnp.exp(-jnp.abs(x)))

    if block_b != acc_rows:
        # Fold rows onto `acc_rows` (=8) sublanes with pure VPU adds; the only
        # cross-lane reduction happens once, outside the kernel.
        elem = elem.reshape(block_b // acc_rows, acc_rows, elem.shape[-1]).sum(axis=0)

    acc_ref[...] += elem

    @pl.when(j == pl.num_programs(1) - 1)
    def _():
        o_ref[...] = acc_ref[...]


def _choose_block(dim, align, target):
    """Largest legal block size <= target: either the full dim, or a divisor
    of dim that is a multiple of `align` (8 for rows, 128 for lanes)."""
    if dim <= target:
        return dim  # full-dim block is always legal
    b = (target // align) * align
    while b >= align:
        if dim % b == 0:
            return b
        b -= align
    # TODO(synk): no aligned divisor found (e.g. prime-ish dim) — fall back to
    # a single full-dim block rather than padding + masking the mean.
    return dim


def bce_with_logits_mean(logits, labels, *, target_block_b=256, target_block_n=2048):
    """Mean BCE-with-logits over all elements of two (B, N) arrays."""
    assert logits.shape == labels.shape, (logits.shape, labels.shape)
    B, N = logits.shape

    block_b = _choose_block(B, 8, target_block_b)
    block_n = _choose_block(N, 128, target_block_n)
    num_rb = B // block_b
    num_cb = N // block_n
    acc_rows = 8 if (block_b % 8 == 0) else block_b

    kernel = functools.partial(
        _bce_with_logits_kernel, block_b=block_b, acc_rows=acc_rows
    )

    partials = pl.pallas_call(
        kernel,
        out_shape=jax.ShapeDtypeStruct((num_rb * acc_rows, block_n), jnp.float32),
        grid_spec=pltpu.PrefetchScalarGridSpec(
            num_scalar_prefetch=0,
            grid=(num_rb, num_cb),
            in_specs=[
                pl.BlockSpec((block_b, block_n), lambda i, j: (i, j)),
                pl.BlockSpec((block_b, block_n), lambda i, j: (i, j)),
            ],
            out_specs=pl.BlockSpec((acc_rows, block_n), lambda i, j: (i, 0)),
            scratch_shapes=[pltpu.VMEM((acc_rows, block_n), jnp.float32)],
        ),
        compiler_params=pltpu.CompilerParams(
            dimension_semantics=("parallel", "arbitrary"),
            vmem_limit_bytes=32 * 1024 * 1024,
        ),
    )(logits, labels)

    # Single tiny cross-lane reduce + mean, done once outside the kernel.
    return jnp.sum(partials) / jnp.float32(B * N)


class BCEWithLogs:
    """JAX/Pallas port of the PyTorch BCEWithLogs module
    (nn.BCEWithLogitsLoss with reduction='mean')."""

    def __call__(self, x, y):
        return {"bce_loss": bce_with_logits_mean(x, y["label"])}


def _ref_bce(x, y):
    x = x.astype(jnp.float32)
    y = y.astype(jnp.float32)
    return jnp.mean(jnp.maximum(x, 0.0) - x * y + jnp.log1p(jnp.exp(-jnp.abs(x))))


if __name__ == "__main__":
    key = jax.random.PRNGKey(0)
    kx, ky = jax.random.split(key)

    # Small BxN logits / labels, matching the module's BxN convention.
    B, N = 8, 256
    logits = jax.random.normal(kx, (B, N), dtype=jnp.float32)
    labels = jax.random.bernoulli(ky, 0.5, (B, N)).astype(jnp.float32)

    loss_mod = BCEWithLogs()
    out = loss_mod(logits, {"label": labels})
    loss = jax.block_until_ready(out["bce_loss"])

    ref = _ref_bce(logits, labels)
    assert jnp.allclose(loss, ref, rtol=1e-5, atol=1e-6), (loss, ref)

    # Also exercise the tiled multi-block path (parallel row axis + column
    # reduction axis) with deliberately small block targets.
    kx2, ky2 = jax.random.split(jax.random.PRNGKey(1))
    B2, N2 = 32, 512
    lg2 = jax.random.normal(kx2, (B2, N2), dtype=jnp.float32)
    lb2 = jax.random.bernoulli(ky2, 0.3, (B2, N2)).astype(jnp.float32)
    loss2 = jax.block_until_ready(
        bce_with_logits_mean(lg2, lb2, target_block_b=16, target_block_n=256)
    )
    ref2 = _ref_bce(lg2, lb2)
    assert jnp.allclose(loss2, ref2, rtol=1e-5, atol=1e-6), (loss2, ref2)

    print("KERNEL_OK")
</pallas_src>

<mosaic_0001>
module attributes {stable_mosaic.version = 11 : i64} {
  func.func @_bce_with_logits_kernel(%arg0: i32, %arg1: i32, %arg2: memref<8x256xf32, #tpu.memory_space<vmem>>, %arg3: memref<8x256xf32, #tpu.memory_space<vmem>>, %arg4: memref<8x256xf32, #tpu.memory_space<vmem>>, %arg5: memref<8x256xf32, #tpu.memory_space<vmem>>) attributes {dimension_semantics = [#tpu.dimension_semantics<parallel>, #tpu.dimension_semantics<arbitrary>], iteration_bounds = array<i64: 1, 1>, scalar_prefetch = 0 : i64, scratch_operands = 1 : i64, tpu.core_type = #tpu.core_type<tc>, window_params = [{transform_indices = @transform_0, window_bounds = array<i64: 8, 256>}, {transform_indices = @transform_1, window_bounds = array<i64: 8, 256>}, {transform_indices = @transform_2, window_bounds = array<i64: 8, 256>}]} {
    %c0_i32 = arith.constant 0 : i32
    %0 = arith.cmpi eq, %arg1, %c0_i32 : i32
    %1 = arith.extui %0 : i1 to i32
    %c0_i32_0 = arith.constant 0 : i32
    %2 = arith.cmpi ne, %1, %c0_i32_0 : i32
    scf.if %2 {
      %cst_12 = arith.constant 0.000000e+00 : f32
      %23 = vector.broadcast %cst_12 : f32 to vector<8x256xf32>
      %c0_13 = arith.constant 0 : index
      %c0_14 = arith.constant 0 : index
      %24 = vector.load %arg5[%c0_13, %c0_14] : memref<8x256xf32, #tpu.memory_space<vmem>>, vector<8x256xf32>
      tpu.vector_store %arg5[%c0_13, %c0_14], %23 {strides = array<i32>} : memref<8x256xf32, #tpu.memory_space<vmem>>, vector<8x256xf32>,
    } else {
    }
    %c0 = arith.constant 0 : index
    %c0_1 = arith.constant 0 : index
    %3 = vector.load %arg2[%c0, %c0_1] : memref<8x256xf32, #tpu.memory_space<vmem>>, vector<8x256xf32>
    %c0_2 = arith.constant 0 : index
    %c0_3 = arith.constant 0 : index
    %4 = vector.load %arg3[%c0_2, %c0_3] : memref<8x256xf32, #tpu.memory_space<vmem>>, vector<8x256xf32>
    %cst = arith.constant 0.000000e+00 : f32
    %5 = vector.broadcast %cst : f32 to vector<8x256xf32>
    %6 = arith.maximumf %3, %5 : vector<8x256xf32>
    %7 = arith.mulf %3, %4 : vector<8x256xf32>
    %8 = arith.subf %6, %7 : vector<8x256xf32>
    %9 = math.absf %3 : vector<8x256xf32>
    %cst_4 = arith.constant 0.000000e+00 : f32
    %10 = vector.broadcast %cst_4 : f32 to vector<8x256xf32>
    %11 = arith.subf %10, %9 : vector<8x256xf32>
    %12 = math.exp %11 : vector<8x256xf32>
    %cst_5 = arith.constant 1.000000e+00 : f32
    %13 = vector.broadcast %cst_5 : f32 to vector<8x256xf32>
    %14 = arith.addf %13, %12 : vector<8x256xf32>
    %15 = math.log %14 : vector<8x256xf32>
    %16 = arith.addf %8, %15 : vector<8x256xf32>
    %c0_6 = arith.constant 0 : index
    %c0_7 = arith.constant 0 : index
    %17 = vector.load %arg5[%c0_6, %c0_7] : memref<8x256xf32, #tpu.memory_space<vmem>>, vector<8x256xf32>
    %18 = arith.addf %17, %16 : vector<8x256xf32>
    %c0_8 = arith.constant 0 : index
    %c0_9 = arith.constant 0 : index
    %19 = vector.load %arg5[%c0_8, %c0_9] : memref<8x256xf32, #tpu.memory_space<vmem>>, vector<8x256xf32>
    tpu.vector_store %arg5[%c0_8, %c0_9], %18 {strides = array<i32>} : memref<8x256xf32, #tpu.memory_space<vmem>>, vector<8x256xf32>,
    %c0_i32_10 = arith.constant 0 : i32
    %20 = arith.cmpi eq, %arg1, %c0_i32_10 : i32
    %21 = arith.extui %20 : i1 to i32
    %c0_i32_11 = arith.constant 0 : i32
    %22 = arith.cmpi ne, %21, %c0_i32_11 : i32
    scf.if %22 {
      %c0_12 = arith.constant 0 : index
      %c0_13 = arith.constant 0 : index
      %23 = vector.load %arg5[%c0_12, %c0_13] : memref<8x256xf32, #tpu.memory_space<vmem>>, vector<8x256xf32>
      %c0_14 = arith.constant 0 : index
      %c0_15 = arith.constant 0 : index
      %24 = vector.load %arg4[%c0_14, %c0_15] : memref<8x256xf32, #tpu.memory_space<vmem>>, vector<8x256xf32>
      tpu.vector_store %arg4[%c0_14, %c0_15], %23 {strides = array<i32>} : memref<8x256xf32, #tpu.memory_space<vmem>>, vector<8x256xf32>,
    } else {
    }
    return
  }
  func.func @transform_0(%arg0: i32, %arg1: i32) -> (i32, i32) {
    %c0_i32 = arith.constant 0 : i32
    return %arg0, %arg1 : i32, i32
  }
  func.func @transform_1(%arg0: i32, %arg1: i32) -> (i32, i32) {
    %c0_i32 = arith.constant 0 : i32
    return %arg0, %arg1 : i32, i32
  }
  func.func @transform_2(%arg0: i32, %arg1: i32) -> (i32, i32) {
    %c0_i32 = arith.constant 0 : i32
    %c0_i32_0 = arith.constant 0 : i32
    return %arg0, %c0_i32 : i32, i32
  }
}

</mosaic_0001>

<bundles_post_ra>
// kernel: tpu_custom_call.1
= control target key start
LH: loop header
LB: loop body
LE: loop exit
PB: predicated region body
PF: predicated region fallthrough
CT: control target
= control target key end

     0   :  { %7 = vsyncpa [#allocation4], 0  ;;  %s219_s0 = inlined_call_operand.hbm [shape: f32[8,256], index: 0, kind: input, shape index: {}]   ;;  %s220_s1 = inlined_call_operand.hbm [shape: f32[8,256], index: 1, kind: input, shape index: {}]   ;;  %s221_s2 = inlined_call_operand.hbm [shape: f32[8,256], index: 2, kind: output, shape index: {}]  }
   0x1   :  { %8 = vsyncpa [#allocation7], 0 }
   0x2   :  { %9 = vsyncpa [#allocation5], 0  ;;  %s15_s11 = sshll.u32 %s219_s0, 4  ;;  %s192_s12 = smov [#allocation3]   ;;  %s16_s11 = int_to_ptr.hbm [resolvable:$true] %s15_s11 }
   0x3   :  { %s17_s13 = sshll.u32 %s192_s12, 4  ;;  %s26_s16 = sshll.u32 %s220_s1, 4  ;;  %s18_s13 = int_to_ptr.vmem [resolvable:$true] %s17_s13  ;;  %s27_s16 = int_to_ptr.hbm [resolvable:$true] %s26_s16 }
   0x4   :  { %20 = dma.hbm_to_vmem [thread:$0]  %s16_s11, 256, %s18_s13, [#allocation4]  }
   0x5   :  { %s193_s17 = smov [#allocation6]  }
   0x6   :  { %s28_s18 = sshll.u32 %s193_s17, 4  ;;  %s29_s18 = int_to_ptr.vmem [resolvable:$true] %s28_s18 }
   0x7   :  { %31 = dma.hbm_to_vmem [thread:$0]  %s27_s16, 256, %s29_s18, [#allocation7]  }
   0x8   :  { %186 = dma.done.wait [#allocation4], 256  }
   0x9   :  { %187 = vsyncadd [#allocation4], 4294967040 }
   0xa   :  { %188 = dma.done.wait [#allocation7], 256  }
   0xb   :  { %189 = vsyncadd [#allocation7], 4294967040  ;;  %v46_v0 = vld [vmem:[#allocation3] sm:$0xff]  ;;  %v47_v1 = vld [vmem:[#allocation3 + $0x8] sm:$0xff]  ;;  %s194_s0 = smov [#allocation8]   ;;  %s92_s21 = sshll.u32 %s221_s2, 4  ;;  %s93_s21 = int_to_ptr.hbm [resolvable:$true] %s92_s21 }
   0xc   :  { %v56_v2 = vand.u32 2147483647, %v46_v0  ;;  %v57_v3 = vand.u32 2147483647, %v47_v1  ;;  %v48_v10 = vld [vmem:[#allocation6] sm:$0xff]  ;;  %v49_v12 = vld [vmem:[#allocation6 + $0x8] sm:$0xff] }
   0xd   :  { %v50_v14 = vmax.f32 %v46_v0, 0.0  ;;  %v52_v15 = vmul.f32 %v48_v10, %v46_v0  ;;  %v51_v16 = vmax.f32 %v47_v1, 0.0  ;;  %v53_v17 = vmul.f32 %v49_v12, %v47_v1  ;;  %s90_s1 = sshll.u32 %s194_s0, 4  ;;  %s91_s1 = int_to_ptr.vmem [resolvable:$true] %s90_s1 }
   0xe   :  { %v58_v4 = vsub.f32 0.0, %v56_v2  ;;  %v59_v5 = vsub.f32 0.0, %v57_v3 }
   0xf   :  { %v54_v18 = vsub.f32 %v50_v14, %v52_v15  ;;  %v55_v20 = vsub.f32 %v51_v16, %v53_v17 }
  0x10   :  { %v60_v6 = vmul.f32 1.442695, %v58_v4  ;;  %v62_v7 = vmul.f32 1.442695, %v59_v5 }
  0x12   :  { %106 = vpow2.f32 %v60_v6 }
  0x13   :  { %108 = vpow2.f32 %v62_v7 }
  0x18   :  { %v107_v8 = vpop.eup %106 }
  0x19   :  { %v109_v9 = vpop.eup %108  ;;  %v64_v11 = vadd.f32 1.0, %v107_v8 }
  0x1a   :  { %v65_v13 = vadd.f32 1.0, %v109_v9 }
  0x1b   :  { %110 = vlog2.f32 %v64_v11 }
  0x1c   :  { %112 = vlog2.f32 %v65_v13 }
  0x21   :  { %v111_v19 = vpop.eup %110 }
  0x22   :  { %v113_v21 = vpop.eup %112  ;;  %v67_v22 = vmul.f32 0.6931472, %v111_v19 }
  0x23   :  { %v69_v23 = vmul.f32 0.6931472, %v113_v21 }
  0x24   :  { %v70_v24 = vadd.f32 %v67_v22, %v54_v18 }
  0x25   :  { %v71_v25 = vadd.f32 %v69_v23, %v55_v20 }
  0x26   :  { %83 = vst [vmem:[#allocation8] sm:$0xff] %v70_v24 }
  0x27   :  { %84 = vst [vmem:[#allocation8 + $0x8] sm:$0xff] %v71_v25 }
  0x28   :  { %95 = dma.vmem_to_hbm [thread:$0]  %s91_s1, 256, %s93_s21, [#allocation5]  }
  0x29   :  { %190 = dma.done.wait [#allocation5], 256  }
  0x2a   :  { %191 = vsyncadd [#allocation5], 4294967040 }
  0x2b   :  { %100 = vsyncpa [#allocation4], 1 }
  0x2c   :  { %101 = vsyncpa [#allocation7], 1 }
  0x2d   :  { %102 = vsyncpa [#allocation5], 1 }

</bundles_post_ra>
